<compile_context>
chip_gen: v7x
topology: tpu7x:2x2x1
jax: 0.10.0
libtpu: 0.0.40
codegen_flags: <defaults>
</compile_context>

<pallas_src>
import math
from functools import partial

import jax
import jax.numpy as jnp
import numpy as np
from jax.experimental import pallas as pl
from jax.experimental.pallas import tpu as pltpu


def _layer_norm(x, gamma, beta, eps=1e-5):
    mean = jnp.mean(x, axis=-1, keepdims=True)
    var = jnp.mean((x - mean) ** 2, axis=-1, keepdims=True)
    return (x - mean) * jax.lax.rsqrt(var + eps) * gamma + beta


def mab_kernel(q_ref, k_ref,
               wq_ref, bq_ref, wkv_ref, bkv_ref,
               wo_ref, bo_ref, g0_ref, b0_ref, g1_ref, b1_ref,
               out_ref, *, num_heads, dim_V, bb, nq, nk):
    cd = q_ref.dtype                     # MXU compute dtype (bf16 by default)
    q = q_ref[...]                       # (bb*nq, dim_Q)
    k = k_ref[...]                       # (bb*nk, dim_K)

    # Input projections on the flattened slab (row-dense MXU matmuls, f32 acc).
    # K and V projections are fused into one (dim_K, 2*dim_V) matmul.
    qp = jnp.dot(q, wq_ref[...], preferred_element_type=jnp.float32) + bq_ref[...]
    kvp = jnp.dot(k, wkv_ref[...], preferred_element_type=jnp.float32) + bkv_ref[...]
    kp = kvp[:, :dim_V]
    vp = kvp[:, dim_V:]

    dsz = dim_V // num_heads
    # NOTE: the PyTorch module scales by sqrt(dim_V), not sqrt(dim_split).
    scale = 1.0 / math.sqrt(dim_V)

    # Fold the scale into Q once, reshape with major-dim splits only (free),
    # cast MXU operands once.
    q_sc = (qp * scale).reshape(bb, nq, dim_V).astype(cd)
    k_at = kp.reshape(bb, nk, dim_V).astype(cd)
    v_at = vp.reshape(bb, nk, dim_V).astype(cd)

    # Static loop over heads; each head's attention is batched over the bb
    # batch elements with single-batch-dim 3-D einsums (known-good Mosaic
    # lowering).  Head outputs stay in registers and are assembled with one
    # lane-axis concatenate — no VMEM scratch and no masked per-head stores.
    # TODO(synk): collapse the head loop into one two-batch-dim dot_general
    # ('bqhd,bkhd->bhqk') once Mosaic's dot_general lowering supports it.
    heads = []
    for h in range(num_heads):
        lo = h * dsz
        qh = q_sc[:, :, lo:lo + dsz]     # (bb, nq, dsz)
        kh = k_at[:, :, lo:lo + dsz]     # (bb, nk, dsz)
        vh = v_at[:, :, lo:lo + dsz]     # (bb, nk, dsz)
        s = jnp.einsum("bqd,bkd->bqk", qh, kh,
                       preferred_element_type=jnp.float32)       # (bb, nq, nk)
        s = s - jnp.max(s, axis=-1, keepdims=True)
        p = jnp.exp(s)
        inv = pl.reciprocal(jnp.sum(p, axis=-1, keepdims=True), approx=True)
        p = p * inv
        heads.append(jnp.einsum("bqk,bkd->bqd", p.astype(cd), vh,
                                preferred_element_type=jnp.float32))

    av = jnp.concatenate(heads, axis=-1).reshape(bb * nq, dim_V)
    hcat = qp + av                       # residual on the unscaled Q projection (f32)

    # layer_norm0
    hcat = _layer_norm(hcat, g0_ref[...], b0_ref[...])

    # H = H + ReLU(fc_o(H))
    o = jnp.dot(hcat.astype(wo_ref.dtype), wo_ref[...],
                preferred_element_type=jnp.float32) + bo_ref[...]
    hcat = hcat + jnp.maximum(o, 0.0)

    # layer_norm1
    hcat = _layer_norm(hcat, g1_ref[...], b1_ref[...])

    out_ref[...] = hcat.astype(out_ref.dtype)


def _vmem_bytes_per_step(bb, Nq, Nk, dim_Q, dim_K, dim_V, in_bytes, out_bytes):
    """Rough per-grid-step VMEM estimate (double-buffered I/O + live f32 temps)."""
    rq, rk = bb * Nq, bb * Nk
    io = 2 * (rq * dim_Q + rk * dim_K) * in_bytes + 2 * rq * dim_V * out_bytes
    inter = 4 * (4 * rq * dim_V + 3 * rk * dim_V) + 8 * bb * Nq * Nk
    return io + inter


def _pick_block_b(B, Nq, Nk, dim_Q, dim_K, dim_V, in_bytes, out_bytes,
                  vmem_budget=40 << 20):
    """Pick a batch tile: sublane-aligned row blocks, >=4 (even) grid steps when
    possible, and a per-step VMEM footprint under `vmem_budget` (safe for
    v7x's 64 MiB; plenty of headroom on v5e/v6e's 128 MiB)."""
    def est(bb):
        return _vmem_bytes_per_step(bb, Nq, Nk, dim_Q, dim_K, dim_V,
                                    in_bytes, out_bytes)

    divisors = [d for d in range(1, B + 1) if B % d == 0]
    aligned = [d for d in divisors
               if ((d * Nq) % 8 == 0 or d == B) and ((d * Nk) % 8 == 0 or d == B)]
    if not aligned:
        aligned = [B]                    # full-array block is always legal
    fitting = [d for d in aligned if est(d) <= vmem_budget]
    cands = fitting if fitting else [min(aligned)]

    def score(bb):
        steps = B // bb
        return (min(steps, 4),                            # >=4 steps: DMA overlap + v7x TC split
                1 if (steps % 2 == 0 or steps == 1) else 0,  # even split across 2 TCs
                bb)                                       # then the biggest tile that fits
    return max(cands, key=score)


def mab_forward(Q, K, params, *, num_heads, block_b=None, mxu_dtype=jnp.bfloat16):
    B, Nq, dim_Q = Q.shape
    _, Nk, dim_K = K.shape
    dim_V = params["wq"].shape[1]
    assert dim_V % num_heads == 0, "dim_V must be divisible by num_heads"
    out_dtype = Q.dtype

    # Present inputs / output as 2-D (batch*set, feature) slabs: matmuls are
    # row-dense and the output store is sublane-dense.
    Q2 = Q.reshape(B * Nq, dim_Q)
    K2 = K.reshape(B * Nk, dim_K)

    wq, wo = params["wq"], params["wo"]
    # Fuse the K-side projections: one (dim_K, 2*dim_V) weight / bias.
    wkv = jnp.concatenate([params["wk"], params["wv"]], axis=1)
    bkv = jnp.concatenate([params["bk"], params["bv"]], axis=1)

    if mxu_dtype is not None:
        # Feed the MXU narrow operands (also halves Q/K/weight HBM->VMEM
        # traffic); softmax / layernorm stay f32 inside the kernel.
        Q2, K2 = Q2.astype(mxu_dtype), K2.astype(mxu_dtype)
        wq, wkv, wo = (w.astype(mxu_dtype) for w in (wq, wkv, wo))

    in_bytes = jnp.dtype(Q2.dtype).itemsize
    out_bytes = jnp.dtype(out_dtype).itemsize

    param_args = [wq, params["bq"], wkv, bkv, wo, params["bo"],
                  params["g0"], params["b0"], params["g1"], params["b1"]]
    param_bytes = sum(int(np.prod(a.shape)) * jnp.dtype(a.dtype).itemsize
                      for a in param_args)

    if block_b is None:
        block_b = _pick_block_b(B, Nq, Nk, dim_Q, dim_K, dim_V,
                                in_bytes, out_bytes)
    assert B % block_b == 0

    vmem_limit = int(min(
        48 << 20,
        max(16 << 20,
            _vmem_bytes_per_step(block_b, Nq, Nk, dim_Q, dim_K, dim_V,
                                 in_bytes, out_bytes)
            + 2 * param_bytes + (4 << 20))))

    # Advisory cost estimate so XLA schedules wrapper-side casts/reshapes
    # around the kernel instead of serializing.
    flops = 2 * (B * Nq * dim_Q * dim_V          # fc_q
                 + B * Nk * dim_K * 2 * dim_V    # fused fc_k | fc_v
                 + 2 * B * Nq * Nk * dim_V       # QK^T + AV over all heads
                 + B * Nq * dim_V * dim_V)       # fc_o
    transcendentals = B * num_heads * Nq * Nk    # softmax exp
    bytes_accessed = (int(Q2.size) * in_bytes + int(K2.size) * in_bytes
                      + B * Nq * dim_V * out_bytes + param_bytes)
    cost = pl.CostEstimate(flops=flops, transcendentals=transcendentals,
                           bytes_accessed=bytes_accessed)

    def full_spec(arr):
        nd = arr.ndim
        # Full-array block + constant index map: block index never changes
        # across the grid, so these are DMA'd once (no per-step refetch).
        return pl.BlockSpec(arr.shape, lambda b, _nd=nd: (0,) * _nd)

    kernel = partial(mab_kernel, num_heads=num_heads, dim_V=dim_V,
                     bb=block_b, nq=Nq, nk=Nk)

    out2 = pl.pallas_call(
        kernel,
        out_shape=jax.ShapeDtypeStruct((B * Nq, dim_V), out_dtype),
        grid_spec=pltpu.PrefetchScalarGridSpec(
            num_scalar_prefetch=0,
            grid=(B // block_b,),
            in_specs=[
                pl.BlockSpec((block_b * Nq, dim_Q), lambda b: (b, 0)),
                pl.BlockSpec((block_b * Nk, dim_K), lambda b: (b, 0)),
            ] + [full_spec(a) for a in param_args],
            out_specs=pl.BlockSpec((block_b * Nq, dim_V), lambda b: (b, 0)),
        ),
        compiler_params=pltpu.CompilerParams(
            dimension_semantics=("parallel",),
            vmem_limit_bytes=vmem_limit),
        cost_estimate=cost,
    )(Q2, K2, *param_args)

    return out2.reshape(B, Nq, dim_V)


def mab_reference(Q, K, params, *, num_heads):
    """Pure-JAX reference matching the PyTorch forward exactly (f32)."""
    dim_V = params["wq"].shape[1]
    Qp = Q @ params["wq"] + params["bq"]
    Kp = K @ params["wk"] + params["bk"]
    Vp = K @ params["wv"] + params["bv"]
    # split along feature, cat along batch
    Q_ = jnp.concatenate(jnp.split(Qp, num_heads, axis=2), axis=0)
    K_ = jnp.concatenate(jnp.split(Kp, num_heads, axis=2), axis=0)
    V_ = jnp.concatenate(jnp.split(Vp, num_heads, axis=2), axis=0)
    A = jax.nn.softmax(jnp.einsum("bqd,bkd->bqk", Q_, K_) / math.sqrt(dim_V), axis=2)
    H_ = Q_ + jnp.einsum("bqk,bkd->bqd", A, V_)
    H = jnp.concatenate(jnp.split(H_, num_heads, axis=0), axis=2)
    H = _layer_norm(H, params["g0"], params["b0"])
    H = H + jax.nn.relu(H @ params["wo"] + params["bo"])
    H = _layer_norm(H, params["g1"], params["b1"])
    return H


if __name__ == "__main__":
    B, Nq, Nk = 8, 8, 16
    dim_Q, dim_K, dim_V, num_heads = 16, 16, 32, 4

    key = jax.random.PRNGKey(0)
    ks = jax.random.split(key, 12)

    # PyTorch Linear layers stored as [in, out]; LayerNorm affine defaults.
    params = {
        "wq": 0.1 * jax.random.normal(ks[0], (dim_Q, dim_V), jnp.float32),
        "bq": 0.1 * jax.random.normal(ks[1], (1, dim_V), jnp.float32),
        "wk": 0.1 * jax.random.normal(ks[2], (dim_K, dim_V), jnp.float32),
        "bk": 0.1 * jax.random.normal(ks[3], (1, dim_V), jnp.float32),
        "wv": 0.1 * jax.random.normal(ks[4], (dim_K, dim_V), jnp.float32),
        "bv": 0.1 * jax.random.normal(ks[5], (1, dim_V), jnp.float32),
        "wo": 0.1 * jax.random.normal(ks[6], (dim_V, dim_V), jnp.float32),
        "bo": 0.1 * jax.random.normal(ks[7], (1, dim_V), jnp.float32),
        "g0": jnp.ones((1, dim_V), jnp.float32),
        "b0": jnp.zeros((1, dim_V), jnp.float32),
        "g1": jnp.ones((1, dim_V), jnp.float32),
        "b1": jnp.zeros((1, dim_V), jnp.float32),
    }

    Q = jax.random.normal(ks[8], (B, Nq, dim_Q), jnp.float32)
    K = jax.random.normal(ks[9], (B, Nk, dim_K), jnp.float32)

    ref = mab_reference(Q, K, params, num_heads=num_heads)

    # f32 MXU path (only deviation from the reference is the approx reciprocal).
    out_f32 = jax.block_until_ready(
        mab_forward(Q, K, params, num_heads=num_heads, mxu_dtype=None))
    np.testing.assert_allclose(np.asarray(out_f32), np.asarray(ref),
                               rtol=2e-2, atol=2e-2)

    # Default path: bf16 MXU operands (v5e/v6e/v7x are bf16-native on the MXU);
    # softmax/layernorm stay f32.
    out_bf16 = jax.block_until_ready(
        mab_forward(Q, K, params, num_heads=num_heads))
    np.testing.assert_allclose(np.asarray(out_bf16), np.asarray(ref),
                               rtol=6e-2, atol=6e-2)

    print("KERNEL_OK")
</pallas_src>

<mosaic_0001>
module attributes {stable_mosaic.version = 11 : i64} {
  func.func @mab_kernel(%arg0: i32, %arg1: memref<16x16xf32, #tpu.memory_space<vmem>>, %arg2: memref<32x16xf32, #tpu.memory_space<vmem>>, %arg3: memref<16x32xf32, #tpu.memory_space<vmem>>, %arg4: memref<1x32xf32, #tpu.memory_space<vmem>>, %arg5: memref<16x64xf32, #tpu.memory_space<vmem>>, %arg6: memref<1x64xf32, #tpu.memory_space<vmem>>, %arg7: memref<32x32xf32, #tpu.memory_space<vmem>>, %arg8: memref<1x32xf32, #tpu.memory_space<vmem>>, %arg9: memref<1x32xf32, #tpu.memory_space<vmem>>, %arg10: memref<1x32xf32, #tpu.memory_space<vmem>>, %arg11: memref<1x32xf32, #tpu.memory_space<vmem>>, %arg12: memref<1x32xf32, #tpu.memory_space<vmem>>, %arg13: memref<16x32xf32, #tpu.memory_space<vmem>>) attributes {dimension_semantics = [#tpu.dimension_semantics<parallel>], iteration_bounds = array<i64: 4>, scalar_prefetch = 0 : i64, scratch_operands = 0 : i64, tpu.core_type = #tpu.core_type<tc>, window_params = [{transform_indices = @transform_0, window_bounds = array<i64: 16, 16>}, {transform_indices = @transform_1, window_bounds = array<i64: 32, 16>}, {pipeline_mode = #tpu.pipeline_mode<synchronous>, transform_indices = @transform_2, window_bounds = array<i64: 16, 32>}, {pipeline_mode = #tpu.pipeline_mode<synchronous>, transform_indices = @transform_3, window_bounds = array<i64: 1, 32>}, {pipeline_mode = #tpu.pipeline_mode<synchronous>, transform_indices = @transform_4, window_bounds = array<i64: 16, 64>}, {pipeline_mode = #tpu.pipeline_mode<synchronous>, transform_indices = @transform_5, window_bounds = array<i64: 1, 64>}, {pipeline_mode = #tpu.pipeline_mode<synchronous>, transform_indices = @transform_6, window_bounds = array<i64: 32, 32>}, {pipeline_mode = #tpu.pipeline_mode<synchronous>, transform_indices = @transform_7, window_bounds = array<i64: 1, 32>}, {pipeline_mode = #tpu.pipeline_mode<synchronous>, transform_indices = @transform_8, window_bounds = array<i64: 1, 32>}, {pipeline_mode = #tpu.pipeline_mode<synchronous>, transform_indices = @transform_9, window_bounds = array<i64: 1, 32>}, {pipeline_mode = #tpu.pipeline_mode<synchronous>, transform_indices = @transform_10, window_bounds = array<i64: 1, 32>}, {pipeline_mode = #tpu.pipeline_mode<synchronous>, transform_indices = @transform_11, window_bounds = array<i64: 1, 32>}, {transform_indices = @transform_12, window_bounds = array<i64: 16, 32>}]} {
    %c0 = arith.constant 0 : index
    %c0_0 = arith.constant 0 : index
    %0 = vector.load %arg1[%c0, %c0_0] : memref<16x16xf32, #tpu.memory_space<vmem>>, vector<16x16xf32>
    %c0_1 = arith.constant 0 : index
    %c0_2 = arith.constant 0 : index
    %1 = vector.load %arg2[%c0_1, %c0_2] : memref<32x16xf32, #tpu.memory_space<vmem>>, vector<32x16xf32>
    %c0_3 = arith.constant 0 : index
    %c0_4 = arith.constant 0 : index
    %2 = vector.load %arg3[%c0_3, %c0_4] : memref<16x32xf32, #tpu.memory_space<vmem>>, vector<16x32xf32>
    %cst = arith.constant dense<0.000000e+00> : vector<16x32xf32>
    %3 = tpu.matmul %0, %2, %cst {dimension_numbers = #tpu.dot_dimension_numbers<[1], [0], [0], [1], [0, 0, 1, 1], [], []>} : vector<16x16xf32>, vector<16x32xf32>, vector<16x32xf32> -> vector<16x32xf32>
    %c0_5 = arith.constant 0 : index
    %c0_6 = arith.constant 0 : index
    %4 = vector.load %arg4[%c0_5, %c0_6] : memref<1x32xf32, #tpu.memory_space<vmem>>, vector<1x32xf32>
    %5 = vector.broadcast %4 : vector<1x32xf32> to vector<16x32xf32>
    %6 = arith.addf %3, %5 : vector<16x32xf32>
    %c0_7 = arith.constant 0 : index
    %c0_8 = arith.constant 0 : index
    %7 = vector.load %arg5[%c0_7, %c0_8] : memref<16x64xf32, #tpu.memory_space<vmem>>, vector<16x64xf32>
    %cst_9 = arith.constant dense<0.000000e+00> : vector<32x64xf32>
    %8 = tpu.matmul %1, %7, %cst_9 {dimension_numbers = #tpu.dot_dimension_numbers<[1], [0], [0], [1], [0, 0, 1, 1], [], []>} : vector<32x16xf32>, vector<16x64xf32>, vector<32x64xf32> -> vector<32x64xf32>
    %c0_10 = arith.constant 0 : index
    %c0_11 = arith.constant 0 : index
    %9 = vector.load %arg6[%c0_10, %c0_11] : memref<1x64xf32, #tpu.memory_space<vmem>>, vector<1x64xf32>
    %10 = vector.broadcast %9 : vector<1x64xf32> to vector<32x64xf32>
    %11 = arith.addf %8, %10 : vector<32x64xf32>
    %12 = vector.extract_strided_slice %11 {offsets = [0, 0], sizes = [32, 32], strides = [1, 1]} : vector<32x64xf32> to vector<32x32xf32>
    %13 = vector.extract_strided_slice %11 {offsets = [0, 32], sizes = [32, 32], strides = [1, 1]} : vector<32x64xf32> to vector<32x32xf32>
    %cst_12 = arith.constant 0.176776692 : f32
    %14 = vector.broadcast %cst_12 : f32 to vector<16x32xf32>
    %15 = arith.mulf %6, %14 : vector<16x32xf32>
    %16 = vector.shape_cast %15 : vector<16x32xf32> to vector<2x8x32xf32>
    %17 = vector.shape_cast %12 : vector<32x32xf32> to vector<2x16x32xf32>
    %18 = vector.shape_cast %13 : vector<32x32xf32> to vector<2x16x32xf32>
    %19 = vector.extract_strided_slice %16 {offsets = [0, 0, 0], sizes = [2, 8, 8], strides = [1, 1, 1]} : vector<2x8x32xf32> to vector<2x8x8xf32>
    %20 = vector.extract_strided_slice %17 {offsets = [0, 0, 0], sizes = [2, 16, 8], strides = [1, 1, 1]} : vector<2x16x32xf32> to vector<2x16x8xf32>
    %21 = vector.extract_strided_slice %18 {offsets = [0, 0, 0], sizes = [2, 16, 8], strides = [1, 1, 1]} : vector<2x16x32xf32> to vector<2x16x8xf32>
    "tpu.trace_start"() <{level = 10 : i32, message = "bqd,bkd->bqk"}> : () -> ()
    %cst_13 = arith.constant dense<0.000000e+00> : vector<2x8x16xf32>
    %22 = tpu.matmul %19, %20, %cst_13 {dimension_numbers = #tpu.dot_dimension_numbers<[2], [2], [1], [1], [0, 0, 0, 1, 1, 1], [0], [0]>} : vector<2x8x8xf32>, vector<2x16x8xf32>, vector<2x8x16xf32> -> vector<2x8x16xf32>
    "tpu.trace_stop"() : () -> ()
    %cst_14 = arith.constant dense<0xFF800000> : vector<2x8xf32>
    %23 = vector.multi_reduction <maximumf>, %22, %cst_14 [2] : vector<2x8x16xf32> to vector<2x8xf32>
    %24 = vector.shape_cast %23 : vector<2x8xf32> to vector<2x8x1xf32>
    %25 = vector.broadcast %24 : vector<2x8x1xf32> to vector<2x8x16xf32>
    %26 = arith.subf %22, %25 : vector<2x8x16xf32>
    %27 = math.exp %26 : vector<2x8x16xf32>
    %cst_15 = arith.constant dense<0.000000e+00> : vector<2x8xf32>
    %28 = vector.multi_reduction <add>, %27, %cst_15 [2] : vector<2x8x16xf32> to vector<2x8xf32>
    %29 = vector.shape_cast %28 : vector<2x8xf32> to vector<2x8x1xf32>
    %30 = tpu.reciprocal %29 {approx = true} : vector<2x8x1xf32> -> vector<2x8x1xf32>
    %31 = vector.broadcast %30 : vector<2x8x1xf32> to vector<2x8x16xf32>
    %32 = arith.mulf %27, %31 : vector<2x8x16xf32>
    "tpu.trace_start"() <{level = 10 : i32, message = "bqk,bkd->bqd"}> : () -> ()
    %cst_16 = arith.constant dense<0.000000e+00> : vector<2x8x8xf32>
    %33 = tpu.matmul %32, %21, %cst_16 {dimension_numbers = #tpu.dot_dimension_numbers<[2], [1], [1], [2], [0, 0, 0, 1, 1, 2], [0], [0]>} : vector<2x8x16xf32>, vector<2x16x8xf32>, vector<2x8x8xf32> -> vector<2x8x8xf32>
    "tpu.trace_stop"() : () -> ()
    %34 = vector.extract_strided_slice %16 {offsets = [0, 0, 8], sizes = [2, 8, 8], strides = [1, 1, 1]} : vector<2x8x32xf32> to vector<2x8x8xf32>
    %35 = vector.extract_strided_slice %17 {offsets = [0, 0, 8], sizes = [2, 16, 8], strides = [1, 1, 1]} : vector<2x16x32xf32> to vector<2x16x8xf32>
    %36 = vector.extract_strided_slice %18 {offsets = [0, 0, 8], sizes = [2, 16, 8], strides = [1, 1, 1]} : vector<2x16x32xf32> to vector<2x16x8xf32>
    "tpu.trace_start"() <{level = 10 : i32, message = "bqd,bkd->bqk"}> : () -> ()
    %cst_17 = arith.constant dense<0.000000e+00> : vector<2x8x16xf32>
    %37 = tpu.matmul %34, %35, %cst_17 {dimension_numbers = #tpu.dot_dimension_numbers<[2], [2], [1], [1], [0, 0, 0, 1, 1, 1], [0], [0]>} : vector<2x8x8xf32>, vector<2x16x8xf32>, vector<2x8x16xf32> -> vector<2x8x16xf32>
    "tpu.trace_stop"() : () -> ()
    %cst_18 = arith.constant dense<0xFF800000> : vector<2x8xf32>
    %38 = vector.multi_reduction <maximumf>, %37, %cst_18 [2] : vector<2x8x16xf32> to vector<2x8xf32>
    %39 = vector.shape_cast %38 : vector<2x8xf32> to vector<2x8x1xf32>
    %40 = vector.broadcast %39 : vector<2x8x1xf32> to vector<2x8x16xf32>
    %41 = arith.subf %37, %40 : vector<2x8x16xf32>
    %42 = math.exp %41 : vector<2x8x16xf32>
    %cst_19 = arith.constant dense<0.000000e+00> : vector<2x8xf32>
    %43 = vector.multi_reduction <add>, %42, %cst_19 [2] : vector<2x8x16xf32> to vector<2x8xf32>
    %44 = vector.shape_cast %43 : vector<2x8xf32> to vector<2x8x1xf32>
    %45 = tpu.reciprocal %44 {approx = true} : vector<2x8x1xf32> -> vector<2x8x1xf32>
    %46 = vector.broadcast %45 : vector<2x8x1xf32> to vector<2x8x16xf32>
    %47 = arith.mulf %42, %46 : vector<2x8x16xf32>
    "tpu.trace_start"() <{level = 10 : i32, message = "bqk,bkd->bqd"}> : () -> ()
    %cst_20 = arith.constant dense<0.000000e+00> : vector<2x8x8xf32>
    %48 = tpu.matmul %47, %36, %cst_20 {dimension_numbers = #tpu.dot_dimension_numbers<[2], [1], [1], [2], [0, 0, 0, 1, 1, 2], [0], [0]>} : vector<2x8x16xf32>, vector<2x16x8xf32>, vector<2x8x8xf32> -> vector<2x8x8xf32>
    "tpu.trace_stop"() : () -> ()
    %49 = vector.extract_strided_slice %16 {offsets = [0, 0, 16], sizes = [2, 8, 8], strides = [1, 1, 1]} : vector<2x8x32xf32> to vector<2x8x8xf32>
    %50 = vector.extract_strided_slice %17 {offsets = [0, 0, 16], sizes = [2, 16, 8], strides = [1, 1, 1]} : vector<2x16x32xf32> to vector<2x16x8xf32>
    %51 = vector.extract_strided_slice %18 {offsets = [0, 0, 16], sizes = [2, 16, 8], strides = [1, 1, 1]} : vector<2x16x32xf32> to vector<2x16x8xf32>
    "tpu.trace_start"() <{level = 10 : i32, message = "bqd,bkd->bqk"}> : () -> ()
    %cst_21 = arith.constant dense<0.000000e+00> : vector<2x8x16xf32>
    %52 = tpu.matmul %49, %50, %cst_21 {dimension_numbers = #tpu.dot_dimension_numbers<[2], [2], [1], [1], [0, 0, 0, 1, 1, 1], [0], [0]>} : vector<2x8x8xf32>, vector<2x16x8xf32>, vector<2x8x16xf32> -> vector<2x8x16xf32>
    "tpu.trace_stop"() : () -> ()
    %cst_22 = arith.constant dense<0xFF800000> : vector<2x8xf32>
    %53 = vector.multi_reduction <maximumf>, %52, %cst_22 [2] : vector<2x8x16xf32> to vector<2x8xf32>
    %54 = vector.shape_cast %53 : vector<2x8xf32> to vector<2x8x1xf32>
    %55 = vector.broadcast %54 : vector<2x8x1xf32> to vector<2x8x16xf32>
    %56 = arith.subf %52, %55 : vector<2x8x16xf32>
    %57 = math.exp %56 : vector<2x8x16xf32>
    %cst_23 = arith.constant dense<0.000000e+00> : vector<2x8xf32>
    %58 = vector.multi_reduction <add>, %57, %cst_23 [2] : vector<2x8x16xf32> to vector<2x8xf32>
    %59 = vector.shape_cast %58 : vector<2x8xf32> to vector<2x8x1xf32>
    %60 = tpu.reciprocal %59 {approx = true} : vector<2x8x1xf32> -> vector<2x8x1xf32>
    %61 = vector.broadcast %60 : vector<2x8x1xf32> to vector<2x8x16xf32>
    %62 = arith.mulf %57, %61 : vector<2x8x16xf32>
    "tpu.trace_start"() <{level = 10 : i32, message = "bqk,bkd->bqd"}> : () -> ()
    %cst_24 = arith.constant dense<0.000000e+00> : vector<2x8x8xf32>
    %63 = tpu.matmul %62, %51, %cst_24 {dimension_numbers = #tpu.dot_dimension_numbers<[2], [1], [1], [2], [0, 0, 0, 1, 1, 2], [0], [0]>} : vector<2x8x16xf32>, vector<2x16x8xf32>, vector<2x8x8xf32> -> vector<2x8x8xf32>
    "tpu.trace_stop"() : () -> ()
    %64 = vector.extract_strided_slice %16 {offsets = [0, 0, 24], sizes = [2, 8, 8], strides = [1, 1, 1]} : vector<2x8x32xf32> to vector<2x8x8xf32>
    %65 = vector.extract_strided_slice %17 {offsets = [0, 0, 24], sizes = [2, 16, 8], strides = [1, 1, 1]} : vector<2x16x32xf32> to vector<2x16x8xf32>
    %66 = vector.extract_strided_slice %18 {offsets = [0, 0, 24], sizes = [2, 16, 8], strides = [1, 1, 1]} : vector<2x16x32xf32> to vector<2x16x8xf32>
    "tpu.trace_start"() <{level = 10 : i32, message = "bqd,bkd->bqk"}> : () -> ()
    %cst_25 = arith.constant dense<0.000000e+00> : vector<2x8x16xf32>
    %67 = tpu.matmul %64, %65, %cst_25 {dimension_numbers = #tpu.dot_dimension_numbers<[2], [2], [1], [1], [0, 0, 0, 1, 1, 1], [0], [0]>} : vector<2x8x8xf32>, vector<2x16x8xf32>, vector<2x8x16xf32> -> vector<2x8x16xf32>
    "tpu.trace_stop"() : () -> ()
    %cst_26 = arith.constant dense<0xFF800000> : vector<2x8xf32>
    %68 = vector.multi_reduction <maximumf>, %67, %cst_26 [2] : vector<2x8x16xf32> to vector<2x8xf32>
    %69 = vector.shape_cast %68 : vector<2x8xf32> to vector<2x8x1xf32>
    %70 = vector.broadcast %69 : vector<2x8x1xf32> to vector<2x8x16xf32>
    %71 = arith.subf %67, %70 : vector<2x8x16xf32>
    %72 = math.exp %71 : vector<2x8x16xf32>
    %cst_27 = arith.constant dense<0.000000e+00> : vector<2x8xf32>
    %73 = vector.multi_reduction <add>, %72, %cst_27 [2] : vector<2x8x16xf32> to vector<2x8xf32>
    %74 = vector.shape_cast %73 : vector<2x8xf32> to vector<2x8x1xf32>
    %75 = tpu.reciprocal %74 {approx = true} : vector<2x8x1xf32> -> vector<2x8x1xf32>
    %76 = vector.broadcast %75 : vector<2x8x1xf32> to vector<2x8x16xf32>
    %77 = arith.mulf %72, %76 : vector<2x8x16xf32>
    "tpu.trace_start"() <{level = 10 : i32, message = "bqk,bkd->bqd"}> : () -> ()
    %cst_28 = arith.constant dense<0.000000e+00> : vector<2x8x8xf32>
    %78 = tpu.matmul %77, %66, %cst_28 {dimension_numbers = #tpu.dot_dimension_numbers<[2], [1], [1], [2], [0, 0, 0, 1, 1, 2], [0], [0]>} : vector<2x8x16xf32>, vector<2x16x8xf32>, vector<2x8x8xf32> -> vector<2x8x8xf32>
    "tpu.trace_stop"() : () -> ()
    %79 = tpu.concatenate %33, %48, %63, %78 in 2 : vector<2x8x8xf32>, vector<2x8x8xf32>, vector<2x8x8xf32>, vector<2x8x8xf32> -> vector<2x8x32xf32>
    %80 = vector.shape_cast %79 : vector<2x8x32xf32> to vector<16x32xf32>
    %81 = arith.addf %6, %80 : vector<16x32xf32>
    %c0_29 = arith.constant 0 : index
    %c0_30 = arith.constant 0 : index
    %82 = vector.load %arg9[%c0_29, %c0_30] : memref<1x32xf32, #tpu.memory_space<vmem>>, vector<1x32xf32>
    %c0_31 = arith.constant 0 : index
    %c0_32 = arith.constant 0 : index
    %83 = vector.load %arg10[%c0_31, %c0_32] : memref<1x32xf32, #tpu.memory_space<vmem>>, vector<1x32xf32>
    %cst_33 = arith.constant dense<0.000000e+00> : vector<16xf32>
    %84 = vector.multi_reduction <add>, %81, %cst_33 [1] : vector<16x32xf32> to vector<16xf32>
    %85 = vector.shape_cast %84 : vector<16xf32> to vector<16x1xf32>
    %cst_34 = arith.constant 3.200000e+01 : f32
    %86 = vector.broadcast %cst_34 : f32 to vector<16x1xf32>
    %87 = arith.divf %85, %86 : vector<16x1xf32>
    %88 = vector.broadcast %87 : vector<16x1xf32> to vector<16x32xf32>
    %89 = arith.subf %81, %88 : vector<16x32xf32>
    %90 = arith.mulf %89, %89 : vector<16x32xf32>
    %cst_35 = arith.constant dense<0.000000e+00> : vector<16xf32>
    %91 = vector.multi_reduction <add>, %90, %cst_35 [1] : vector<16x32xf32> to vector<16xf32>
    %92 = vector.shape_cast %91 : vector<16xf32> to vector<16x1xf32>
    %cst_36 = arith.constant 3.200000e+01 : f32
    %93 = vector.broadcast %cst_36 : f32 to vector<16x1xf32>
    %94 = arith.divf %92, %93 : vector<16x1xf32>
    %95 = vector.broadcast %87 : vector<16x1xf32> to vector<16x32xf32>
    %96 = arith.subf %81, %95 : vector<16x32xf32>
    %cst_37 = arith.constant 9.99999974E-6 : f32
    %97 = vector.broadcast %cst_37 : f32 to vector<16x1xf32>
    %98 = arith.addf %94, %97 : vector<16x1xf32>
    %99 = math.rsqrt %98 : vector<16x1xf32>
    %100 = vector.broadcast %99 : vector<16x1xf32> to vector<16x32xf32>
    %101 = arith.mulf %96, %100 : vector<16x32xf32>
    %102 = vector.broadcast %82 : vector<1x32xf32> to vector<16x32xf32>
    %103 = arith.mulf %101, %102 : vector<16x32xf32>
    %104 = vector.broadcast %83 : vector<1x32xf32> to vector<16x32xf32>
    %105 = arith.addf %103, %104 : vector<16x32xf32>
    %c0_38 = arith.constant 0 : index
    %c0_39 = arith.constant 0 : index
    %106 = vector.load %arg7[%c0_38, %c0_39] : memref<32x32xf32, #tpu.memory_space<vmem>>, vector<32x32xf32>
    %cst_40 = arith.constant dense<0.000000e+00> : vector<16x32xf32>
    %107 = tpu.matmul %105, %106, %cst_40 {dimension_numbers = #tpu.dot_dimension_numbers<[1], [0], [0], [1], [0, 0, 1, 1], [], []>} : vector<16x32xf32>, vector<32x32xf32>, vector<16x32xf32> -> vector<16x32xf32>
    %c0_41 = arith.constant 0 : index
    %c0_42 = arith.constant 0 : index
    %108 = vector.load %arg8[%c0_41, %c0_42] : memref<1x32xf32, #tpu.memory_space<vmem>>, vector<1x32xf32>
    %109 = vector.broadcast %108 : vector<1x32xf32> to vector<16x32xf32>
    %110 = arith.addf %107, %109 : vector<16x32xf32>
    %cst_43 = arith.constant 0.000000e+00 : f32
    %111 = vector.broadcast %cst_43 : f32 to vector<16x32xf32>
    %112 = arith.maximumf %110, %111 : vector<16x32xf32>
    %113 = arith.addf %105, %112 : vector<16x32xf32>
    %c0_44 = arith.constant 0 : index
    %c0_45 = arith.constant 0 : index
    %114 = vector.load %arg11[%c0_44, %c0_45] : memref<1x32xf32, #tpu.memory_space<vmem>>, vector<1x32xf32>
    %c0_46 = arith.constant 0 : index
    %c0_47 = arith.constant 0 : index
    %115 = vector.load %arg12[%c0_46, %c0_47] : memref<1x32xf32, #tpu.memory_space<vmem>>, vector<1x32xf32>
    %cst_48 = arith.constant dense<0.000000e+00> : vector<16xf32>
    %116 = vector.multi_reduction <add>, %113, %cst_48 [1] : vector<16x32xf32> to vector<16xf32>
    %117 = vector.shape_cast %116 : vector<16xf32> to vector<16x1xf32>
    %cst_49 = arith.constant 3.200000e+01 : f32
    %118 = vector.broadcast %cst_49 : f32 to vector<16x1xf32>
    %119 = arith.divf %117, %118 : vector<16x1xf32>
    %120 = vector.broadcast %119 : vector<16x1xf32> to vector<16x32xf32>
    %121 = arith.subf %113, %120 : vector<16x32xf32>
    %122 = arith.mulf %121, %121 : vector<16x32xf32>
    %cst_50 = arith.constant dense<0.000000e+00> : vector<16xf32>
    %123 = vector.multi_reduction <add>, %122, %cst_50 [1] : vector<16x32xf32> to vector<16xf32>
    %124 = vector.shape_cast %123 : vector<16xf32> to vector<16x1xf32>
    %cst_51 = arith.constant 3.200000e+01 : f32
    %125 = vector.broadcast %cst_51 : f32 to vector<16x1xf32>
    %126 = arith.divf %124, %125 : vector<16x1xf32>
    %127 = vector.broadcast %119 : vector<16x1xf32> to vector<16x32xf32>
    %128 = arith.subf %113, %127 : vector<16x32xf32>
    %cst_52 = arith.constant 9.99999974E-6 : f32
    %129 = vector.broadcast %cst_52 : f32 to vector<16x1xf32>
    %130 = arith.addf %126, %129 : vector<16x1xf32>
    %131 = math.rsqrt %130 : vector<16x1xf32>
    %132 = vector.broadcast %131 : vector<16x1xf32> to vector<16x32xf32>
    %133 = arith.mulf %128, %132 : vector<16x32xf32>
    %134 = vector.broadcast %114 : vector<1x32xf32> to vector<16x32xf32>
    %135 = arith.mulf %133, %134 : vector<16x32xf32>
    %136 = vector.broadcast %115 : vector<1x32xf32> to vector<16x32xf32>
    %137 = arith.addf %135, %136 : vector<16x32xf32>
    %c0_53 = arith.constant 0 : index
    %c0_54 = arith.constant 0 : index
    %138 = vector.load %arg13[%c0_53, %c0_54] : memref<16x32xf32, #tpu.memory_space<vmem>>, vector<16x32xf32>
    tpu.vector_store %arg13[%c0_53, %c0_54], %137 {strides = array<i32>} : memref<16x32xf32, #tpu.memory_space<vmem>>, vector<16x32xf32>,
    return
  }
  func.func @transform_0(%arg0: i32) -> (i32, i32) {
    %c0_i32 = arith.constant 0 : i32
    %c0_i32_0 = arith.constant 0 : i32
    return %arg0, %c0_i32 : i32, i32
  }
  func.func @transform_1(%arg0: i32) -> (i32, i32) {
    %c0_i32 = arith.constant 0 : i32
    %c0_i32_0 = arith.constant 0 : i32
    return %arg0, %c0_i32 : i32, i32
  }
  func.func @transform_2(%arg0: i32) -> (i32, i32) {
    %c0_i32 = arith.constant 0 : i32
    %c0_i32_0 = arith.constant 0 : i32
    %c0_i32_1 = arith.constant 0 : i32
    return %c0_i32, %c0_i32_0 : i32, i32
  }
  func.func @transform_3(%arg0: i32) -> (i32, i32) {
    %c0_i32 = arith.constant 0 : i32
    %c0_i32_0 = arith.constant 0 : i32
    %c0_i32_1 = arith.constant 0 : i32
    return %c0_i32, %c0_i32_0 : i32, i32
  }
  func.func @transform_4(%arg0: i32) -> (i32, i32) {
    %c0_i32 = arith.constant 0 : i32
    %c0_i32_0 = arith.constant 0 : i32
    %c0_i32_1 = arith.constant 0 : i32
    return %c0_i32, %c0_i32_0 : i32, i32
  }
  func.func @transform_5(%arg0: i32) -> (i32, i32) {
    %c0_i32 = arith.constant 0 : i32
    %c0_i32_0 = arith.constant 0 : i32
    %c0_i32_1 = arith.constant 0 : i32
    return %c0_i32, %c0_i32_0 : i32, i32
  }
  func.func @transform_6(%arg0: i32) -> (i32, i32) {
    %c0_i32 = arith.constant 0 : i32
    %c0_i32_0 = arith.constant 0 : i32
    %c0_i32_1 = arith.constant 0 : i32
    return %c0_i32, %c0_i32_0 : i32, i32
  }
  func.func @transform_7(%arg0: i32) -> (i32, i32) {
    %c0_i32 = arith.constant 0 : i32
    %c0_i32_0 = arith.constant 0 : i32
    %c0_i32_1 = arith.constant 0 : i32
    return %c0_i32, %c0_i32_0 : i32, i32
  }
  func.func @transform_8(%arg0: i32) -> (i32, i32) {
    %c0_i32 = arith.constant 0 : i32
    %c0_i32_0 = arith.constant 0 : i32
    %c0_i32_1 = arith.constant 0 : i32
    return %c0_i32, %c0_i32_0 : i32, i32
  }
  func.func @transform_9(%arg0: i32) -> (i32, i32) {
    %c0_i32 = arith.constant 0 : i32
    %c0_i32_0 = arith.constant 0 : i32
    %c0_i32_1 = arith.constant 0 : i32
    return %c0_i32, %c0_i32_0 : i32, i32
  }
  func.func @transform_10(%arg0: i32) -> (i32, i32) {
    %c0_i32 = arith.constant 0 : i32
    %c0_i32_0 = arith.constant 0 : i32
    %c0_i32_1 = arith.constant 0 : i32
    return %c0_i32, %c0_i32_0 : i32, i32
  }
  func.func @transform_11(%arg0: i32) -> (i32, i32) {
    %c0_i32 = arith.constant 0 : i32
    %c0_i32_0 = arith.constant 0 : i32
    %c0_i32_1 = arith.constant 0 : i32
    return %c0_i32, %c0_i32_0 : i32, i32
  }
  func.func @transform_12(%arg0: i32) -> (i32, i32) {
    %c0_i32 = arith.constant 0 : i32
    %c0_i32_0 = arith.constant 0 : i32
    return %arg0, %c0_i32 : i32, i32
  }
}

</mosaic_0001>

<bundles_post_ra>
// kernel: tpu_custom_call.1
= control target key start
LH: loop header
LB: loop body
LE: loop exit
PB: predicated region body
PF: predicated region fallthrough
CT: control target
= control target key end

     0   :  { %s2857_s21 = smov 0   ;;  %s3107_s0 = inlined_call_operand.vmem [shape: f32[64,16], index: 0, kind: input, shape index: {}]   ;;  %s3108_s1 = inlined_call_operand.vmem [shape: f32[128,16], index: 1, kind: input, shape index: {}]   ;;  %s3109_s2 = inlined_call_operand.vmem [shape: f32[16,32], index: 2, kind: input, shape index: {}]   ;;  %s3110_s3 = inlined_call_operand.vmem [shape: f32[1,32], index: 3, kind: input, shape index: {}]   ;;  %s3111_s4 = inlined_call_operand.vmem [shape: f32[16,64], index: 4, kind: input, shape index: {}]   ;;  %s3112_s5 = inlined_call_operand.vmem [shape: f32[1,64], index: 5, kind: input, shape index: {}]   ;;  %s3113_s6 = inlined_call_operand.vmem [shape: f32[32,32], index: 6, kind: input, shape index: {}]   ;;  %s3114_s7 = inlined_call_operand.vmem [shape: f32[1,32], index: 7, kind: input, shape index: {}]   ;;  %s3115_s8 = inlined_call_operand.vmem [shape: f32[1,32], index: 8, kind: input, shape index: {}]   ;;  %s3116_s9 = inlined_call_operand.vmem [shape: f32[1,32], index: 9, kind: input, shape index: {}]   ;;  %s3117_s10 = inlined_call_operand.vmem [shape: f32[1,32], index: 10, kind: input, shape index: {}]   ;;  %s3118_s11 = inlined_call_operand.vmem [shape: f32[1,32], index: 11, kind: input, shape index: {}]   ;;  %s3119_s12 = inlined_call_operand.vmem [shape: f32[64,32], index: 12, kind: output, shape index: {}]  }
   0x1 LB: > { %s2304_s22 = sadd.s32 4294967295, %s2777_s21   ;;  %p2308_p0 = scmp.ge.s32.totalorder %s2777_s21, 1  ;;  %s2777_s21 = sphi %s2857_s21, %s22_s21  }
   0x2   : > { %p374_p1 = scmp.lt.s32.totalorder %s2777_s21, 5 }
   0x4   : > { %p375_p2 = pnand %p2308_p0, %p374_p1 }
   0x5   : > { %v445_v0 = vld [vmem:[%s3109_s2] sm:$0xff] (!%p375_p2)  ;;  %v446_v1 = vld [vmem:[%s3109_s2 + $0x8] sm:$0xff] (!%p375_p2)  ;;  %s2309_s27 = sshll.u32 (!%p375_p2), %s2304_s22, 1  ;;  %s2311_s30 = sshll.u32 (!%p375_p2), %s2304_s22, 2  ;;  %vm454_vm0 = vcmask (!%p375_p2), 130048   ;;  %v2779_v12 = vmov (!%p375_p2), 0.0|0.0  }
   0x6   : > { %378 = sbr.rel (%p375_p2) target bundleno = 3570 (0xdf2), region = 68  ;;  %v536_v2 = vld [vmem:[%s3111_s4] sm:$0xff] (!%p375_p2)  ;;  %v2568_v3 = vpack.c.bf16 (!%p375_p2), %v446_v1, %v445_v0  ;;  %p422_p3 = scmp.lt.s32.totalorder (!%p375_p2), %s2309_s27, 7  ;;  %v537_v4 = vld [vmem:[%s3111_s4 + $0x8] sm:$0xff] (!%p375_p2)  ;;  %2576 = vmatprep.subr.bf16.mxu0 (!%p375_p2), %v2779_v12  ;;  %vm2780_vm1 = vmmov (!%p375_p2), 0   ;;  %v2781_v13 = vmov (!%p375_p2), 0.0  }
   0x7   : > { %p428_p4 = scmp.lt.s32.totalorder (!%p375_p2), %s2311_s30, 15  ;;  %v2572_v5 = vpack.c.bf16 (!%p375_p2), %v537_v4, %v536_v2  ;;  %2449 = vmatprep.mubr.msk.f32.mxu0 (!%p375_p2), %vm2780_vm1, %v2781_v13  ;;  %v2318_v16 = vld [vmem:[%s3112_s5] ss:$0 sm:$0xff] (!%p375_p2)  ;;  %vm644_vm2 = vcmask (!%p375_p2), 64512   ;;  %s2782_s29 = smov (!%p375_p2), 96   ;;  %vm2043_vm4 = vcmask (!%p375_p2), 195584  }
   0x8   : > { %2569 = vmatprep.subr.bf16.mxu1 (!%p375_p2), %v2568_v3  ;;  %vm2905_vm3 = vmpackc.low (!%p375_p2), %vm644_vm2, %vm644_vm2  ;;  %v2315_v22 = vld [vmem:[%s3110_s3] ss:$0 sm:$0xff] (!%p375_p2)  ;;  %s2784_s13 = smov (!%p375_p2), 88   ;;  %s2785_s14 = smov (!%p375_p2), 112   ;;  %vm2050_vm5 = vcmask (!%p375_p2), 261120  }
   0x9   : > { %2571 = vmatpush3.bf16.msra.mxu1 (!%p375_p2), %v2568_v3  ;;  %s2786_s16 = smov (!%p375_p2), 80   ;;  %s2787_s17 = smov (!%p375_p2), 104  }
   0xa   : > { %2573 = vmatprep.subr.bf16.mxu1 (!%p375_p2), %v2572_v5  ;;  %s2790_s20 = smov (!%p375_p2), 16   ;;  %s2791_s22 = smov (!%p375_p2), 24  }
   0xd   : > { %s3123_s27 = smov (!%p422_p3, %s2309_s27), 7  ;;  %s3125_s30 = smov (!%p428_p4, %s2311_s30), 15 }
   0xe   : > { %s2310_s15 = sshll.u32 %s3123_s27, 3  ;;  %s2312_s19 = sshll.u32 %s3125_s30, 3 }
   0xf   : > { %s425_s18 = scalar_lea.vmem %s3107_s0, %s2310_s15  ;;  %s431_s23 = scalar_lea.vmem %s3108_s1, %s2312_s19 }
  0x10   : > { %v439_v6 = vld [vmem:[%s425_s18] sm:$0xff]  ;;  %v440_v7 = vld [vmem:[%s425_s18 + $0x8] sm:$0xff]  ;;  %v443_v10 = vld [vmem:[%s431_s23 + $0x10] sm:$0xff]  ;;  %s2783_s30 = smov 120   ;;  %s2788_s18 = smov 72  }
  0x11   : > { %2432 = vmatprep.mubr.msk.f32.mxu1 %vm454_vm0, %v439_v6  ;;  %v441_v8 = vld [vmem:[%s431_s23] sm:$0xff]  ;;  %v442_v9 = vld [vmem:[%s431_s23 + $0x8] sm:$0xff]  ;;  %v444_v11 = vld [vmem:[%s431_s23 + $0x18] sm:$0xff]  ;;  %s2789_s19 = smov 8  }
  0x12   : > { %2433 = vmatmul.mubr.msk.f32.vlgmr.msra.gmra.mrb[0].mxu1 %vm454_vm0, %v440_v7 }
  0x13   : > { %2575 = vmatpush3.bf16.msra.mxu1 %v2572_v5  ;;  %2439 = vmatprep.mubr.msk.f32.mxu1 %vm454_vm0, %v441_v8 }
  0x14   : > { %2580 = vmatprep.subr.bf16.mxu1 %v2779_v12 }
  0x16   : > { %2440 = vmatmul.mubr.msk.f32.vlgmr.msra.gmra.mrb[2].mxu1 %vm454_vm0, %v442_v9 }
  0x17   : > { %2442 = vmatprep.mubr.msk.f32.mxu1 %vm454_vm0, %v443_v10 }
  0x1a   : > { %2443 = vmatmul.mubr.msk.f32.gmra.mrb[4].mxu1 %vm454_vm0, %v444_v11 }
  0x1b   : > { %2456 = vmatprep.mubr.msk.f32.mxu1 %vm2780_vm1, %v2781_v13 }
  0xe5   : > { %v2434_v14 = vpop.f32.mrb[0].mxu1 }
  0xe6   : > { %v527_v15 = vpop.f32.mrb[1].mxu1  ;;  %v2924_v32 = vadd.f32 %v2434_v14, %v2315_v22 }
  0xe7   : > { %v2916_v29 = vadd.f32 %v2315_v22, %v527_v15 }
  0xe8   : > { %v2937_v34 = vmul.f32 0.17677669, %v2924_v32 }
  0xe9   : > { %v2441_v17 = vpop.f32.mrb[2].mxu1  ;;  %v2927_v33 = vmul.f32 0.17677669, %v2916_v29 }
  0xea   : > { %v629_v18 = vadd.f32 %v2441_v17, %v2318_v16  ;;  %v623_v19 = vpop.f32.mrb[3].mxu1 }
  0xeb   : > { %v624_v20 = vadd.f32 %v2318_v16, %v623_v19 }
  0xed   : > { %v2444_v23 = vpop.f32.mrb[4].mxu1  ;;  %v2577_v24 = vpack.c.bf16 %v629_v18, %v624_v20  ;;  %v2912_v25 = vpack.i.bf16 %v629_v18, %v624_v20 }
  0xee   : > { %v639_v26 = vadd.f32 %v2444_v23, %v2318_v16  ;;  %v633_v27 = vpop.f32.mrb[5].mxu1 }
  0xef   : > { %v634_v28 = vadd.f32 %v2318_v16, %v633_v27  ;;  %2579 = vmatpush3.bf16.xpose.msk.msra.mxu0 %vm2905_vm3, %v2577_v24 }
  0xf0   : > { %2584 = vmatprep.subr.bf16.mxu0 %v2779_v12 }
  0xf1   : > { %v2919_v30 = vpack.i.bf16 %v639_v26, %v634_v28  ;;  %v2581_v31 = vpack.c.bf16 %v639_v26, %v634_v28 }
  0xf3   : > { %2667 = vrot.lane.b32.xlu1 %v2919_v30, %s2782_s29  ;;  %2583 = vmatpush3.bf16.xpose.msk.msra.mxu1 %vm2905_vm3, %v2581_v31 }
  0xf4   : > { %2587 = vmatprep.subr.bf16.mxu1 %v2779_v12 }
  0xf6   : > { %2450 = vmatmul.mubr.msk.f32.vlgmr.msra.gmra.mrb[0].mxu0 %vm644_vm2, %v2927_v33 }
  0xf7   : > { %2672 = vrot.lane.b32.xlu1 %v2912_v25, %s2783_s30  ;;  %2463 = vmatprep.mubr.msk.f32.mxu0 %vm2780_vm1, %v2781_v13 }
  0xfa   : > { %2457 = vmatmul.mubr.msk.f32.vlgmr.msra.gmra.mrb[6].mxu1 %vm644_vm2, %v2937_v34 }
  0xfb   : > { %2677 = vrot.lane.b32.xlu1 %v2919_v30, %s2783_s30  ;;  %2470 = vmatprep.mubr.msk.f32.mxu1 %vm2780_vm1, %v2781_v13 }
 0x165   : > { %v2668_v35 = vpop.permute.xlu1 %2667 }
 0x166   : > { %v2670_v36 = vunpack.i.h.bf16 %v2668_v35  ;;  %v2669_v37 = vunpack.i.l.bf16 %v2668_v35 }
 0x168   : > { %v2588_v38 = vpack.c.bf16 %v2670_v36, %v2669_v37 }
 0x169   : > { %v2673_v59 = vpop.permute.xlu1 %2672 }
 0x16a   : > { %2589 = vmatpush3.bf16.msra.mxu1 %v2588_v38  ;;  %v2675_v63 = vunpack.i.h.bf16 %v2673_v59  ;;  %v2674_v0 = vunpack.i.l.bf16 %v2673_v59 }
 0x16b   : > { %2594 = vmatprep.subr.bf16.mxu1 %v2779_v12 }
 0x16c   : > { %v2591_v3 = vpack.c.bf16 %v2675_v63, %v2674_v0 }
 0x16d   : > { %v2678_v60 = vpop.permute.xlu1 %2677 }
 0x16e   : > { %v2680_v4 = vunpack.i.h.bf16 %v2678_v60  ;;  %v2679_v5 = vunpack.i.l.bf16 %v2678_v60 }
 0x170   : > { %v2595_v8 = vpack.c.bf16 %v2680_v4, %v2679_v5 }
 0x1c9   : > { %v720_v39 = vpop.f32.mrb[0].mxu0 }
 0x1ca   : > { %v2451_v40 = vpop.f32.mrb[1].mxu0  ;;  %v803_v41 = vsel %vm454_vm0, %v720_v39, -inf }
 0x1cb   : > { %804 = vmax.xlane.f32.xlu0 %v803_v41 }
 0x1cd   : > { %v799_v42 = vpop.f32.mrb[6].mxu1 }
 0x1ce   : > { %v2458_v43 = vpop.f32.mrb[7].mxu1  ;;  %v806_v44 = vsel %vm454_vm0, %v799_v42, -inf }
 0x1cf   : > { %807 = vmax.xlane.f32.xlu0 %v806_v44 }
 0x1e5   : > { %2662 = vrot.lane.b32.xlu0 %v2912_v25, %s2782_s29  ;;  %s437_s29 = scalar_lea.vmem %s3119_s12, %s2310_s15 }
 0x1e9   : > { %983 = vrot.lane.b32.xlu0 %v2927_v33, %s2783_s30 }
 0x258   : > { %v805_v45 = vpop.xlane.xlu0 %804 }
 0x259   : > { %v809_v46 = vsub.f32 %v720_v39, %v805_v45 }
 0x25b   : > { %v811_v47 = vmul.f32 1.442695, %v809_v46 }
 0x25c   : > { %v808_v48 = vpop.xlane.xlu0 %807 }
 0x25d   : > { %2731 = vpow2.f32 %v811_v47  ;;  %v810_v49 = vsub.f32 %v799_v42, %v808_v48 }
 0x25f   : > { %v813_v50 = vmul.f32 1.442695, %v810_v49 }
 0x260   : > { %v2663_v51 = vpop.permute.xlu0 %2662 }
 0x261   : > { %2733 = vpow2.f32 %v813_v50  ;;  %v2665_v52 = vunpack.i.h.bf16 %v2663_v51  ;;  %v2664_v53 = vunpack.i.l.bf16 %v2663_v51 }
 0x263   : > { %v2585_v54 = vpack.c.bf16 %v2665_v52, %v2664_v53 }
 0x264   : > { %v984_v9 = vpop.permute.xlu0 %983 }
 0x265   : > { %2586 = vmatpush3.bf16.msra.mxu0 %v2585_v54 }
 0x266   : > { %2590 = vmatprep.subr.bf16.mxu0 %v2779_v12 }
 0x267   : > { %v2732_v55 = vpop.eup %2731 }
 0x268   : > { %v815_v56 = vsel %vm454_vm0, %v2732_v55, 0.0 }
 0x269   : > { %816 = vadd.xlane.f32.xlu1 %v815_v56 }
 0x26b   : > { %v2734_v57 = vpop.eup %2733 }
 0x26c   : > { %v818_v58 = vsel %vm454_vm0, %v2734_v57, 0.0 }
 0x26d   : > { %819 = vadd.xlane.f32.xlu1 %v818_v58 }
 0x27e   : > { %1065 = vrot.lane.b32.xlu1 %v2937_v34, %s2783_s30 }
 0x2f6   : > { %v817_v61 = vpop.xlane.xlu1 %816 }
 0x2f7   : > { %2735 = vrcp.f32 %v817_v61 }
 0x2fa   : > { %v820_v62 = vpop.xlane.xlu1 %819 }
 0x2fb   : > { %2737 = vrcp.f32 %v820_v62 }
 0x2fe   : > { %v1066_v10 = vpop.permute.xlu1 %1065 }
 0x301   : > { %v2736_v1 = vpop.eup %2735 }
 0x302   : > { %v823_v2 = vmul.f32 %v2736_v1, %v2732_v55 }
 0x304   : > { %2464 = vmatmul.mubr.msk.f32.vlgmr.msra.gmra.mrb[2].mxu0 %vm454_vm0, %v823_v2 }
 0x305   : > { %v2738_v6 = vpop.eup %2737  ;;  %2593 = vmatpush3.bf16.xpose.msk.msra.mxu0 %vm2905_vm3, %v2591_v3  ;;  %2477 = vmatprep.mubr.msk.f32.mxu0 %vm2780_vm1, %v2781_v13 }
 0x306   : > { %v824_v7 = vmul.f32 %v2738_v6, %v2734_v57  ;;  %2598 = vmatprep.subr.bf16.mxu0 %v2779_v12 }
 0x308   : > { %2471 = vmatmul.mubr.msk.f32.vlgmr.msra.gmra.mrb[8].mxu1 %vm454_vm0, %v824_v7 }
 0x309   : > { %2597 = vmatpush3.bf16.xpose.msk.msra.mxu1 %vm2905_vm3, %v2595_v8  ;;  %2484 = vmatprep.mubr.msk.f32.mxu1 %vm2780_vm1, %v2781_v13 }
 0x30a   : > { %2601 = vmatprep.subr.bf16.mxu1 %v2779_v12 }
 0x30c   : > { %2478 = vmatmul.mubr.msk.f32.vlgmr.msra.gmra.mrb[4].mxu0 %vm644_vm2, %v984_v9 }
 0x30d   : > { %2491 = vmatprep.mubr.msk.f32.mxu0 %vm2780_vm1, %v2781_v13 }
 0x310   : > { %2485 = vmatmul.mubr.msk.f32.vlgmr.msra.gmra.mrb[10].mxu1 %vm644_vm2, %v1066_v10 }
 0x311   : > { %2498 = vmatprep.mubr.msk.f32.mxu1 %vm2780_vm1, %v2781_v13 }
 0x3d7   : > { %v2974_v11 = vpop.f32.mrb[2].mxu0 }
 0x3d8   : > { %v2465_v14 = vpop.f32.mrb[3].mxu0 }
 0x3db   : > { %v2976_v15 = vpop.f32.mrb[8].mxu1 }
 0x3dc   : > { %v2472_v16 = vpop.f32.mrb[9].mxu1 }
 0x3df   : > { %v1061_v17 = vpop.f32.mrb[4].mxu0 }
 0x3e0   : > { %v2479_v18 = vpop.f32.mrb[5].mxu0  ;;  %v1147_v19 = vsel %vm454_vm0, %v1061_v17, -inf }
 0x3e1   : > { %1148 = vmax.xlane.f32.xlu0 %v1147_v19 }
 0x3e3   : > { %v1143_v20 = vpop.f32.mrb[10].mxu1 }
 0x3e4   : > { %v2486_v22 = vpop.f32.mrb[11].mxu1  ;;  %v1150_v23 = vsel %vm454_vm0, %v1143_v20, -inf }
 0x3e5   : > { %1151 = vmax.xlane.f32.xlu1 %v1150_v23 }
 0x3f6   : > { %2687 = vrot.lane.b32.xlu1 %v2919_v30, %s2784_s13 }
 0x3fa   : > { %2692 = vrot.lane.b32.xlu1 %v2912_v25, %s2785_s14 }
 0x3fe   : > { %2697 = vrot.lane.b32.xlu1 %v2919_v30, %s2785_s14 }
 0x402   : > { %1409 = vrot.lane.b32.xlu1 %v2937_v34, %s2785_s14 }
 0x46e   : > { %v1149_v24 = vpop.xlane.xlu0 %1148 }
 0x46f   : > { %v1153_v26 = vsub.f32 %v1061_v17, %v1149_v24 }
 0x471   : > { %v1155_v27 = vmul.f32 1.442695, %v1153_v26 }
 0x472   : > { %v1152_v28 = vpop.xlane.xlu1 %1151 }
 0x473   : > { %2739 = vpow2.f32 %v1155_v27  ;;  %v1154_v31 = vsub.f32 %v1143_v20, %v1152_v28 }
 0x475   : > { %v1157_v35 = vmul.f32 1.442695, %v1154_v31 }
 0x476   : > { %v2688_v36 = vpop.permute.xlu1 %2687 }
 0x477   : > { %2741 = vpow2.f32 %v1157_v35  ;;  %v2690_v37 = vunpack.i.h.bf16 %v2688_v36  ;;  %v2689_v38 = vunpack.i.l.bf16 %v2688_v36 }
 0x479   : > { %v2602_v39 = vpack.c.bf16 %v2690_v37, %v2689_v38 }
 0x47a   : > { %v2693_v45 = vpop.permute.xlu1 %2692 }
 0x47b   : > { %2603 = vmatpush3.bf16.msra.mxu1 %v2602_v39  ;;  %v2695_v57 = vunpack.i.h.bf16 %v2693_v45  ;;  %v2694_v58 = vunpack.i.l.bf16 %v2693_v45 }
 0x47c   : > { %2608 = vmatprep.subr.bf16.mxu1 %v2779_v12 }
 0x47d   : > { %v2740_v40 = vpop.eup %2739  ;;  %v2605_v61 = vpack.c.bf16 %v2695_v57, %v2694_v58 }
 0x47e   : > { %v1159_v41 = vsel %vm454_vm0, %v2740_v40, 0.0  ;;  %v2698_v50 = vpop.permute.xlu1 %2697 }
 0x47f   : > { %1160 = vadd.xlane.f32.xlu0 %v1159_v41  ;;  %v2700_v53 = vunpack.i.h.bf16 %v2698_v50  ;;  %v2699_v54 = vunpack.i.l.bf16 %v2698_v50 }
 0x481   : > { %v2742_v42 = vpop.eup %2741  ;;  %v2609_v60 = vpack.c.bf16 %v2700_v53, %v2699_v54 }
 0x482   : > { %v1162_v43 = vsel %vm454_vm0, %v2742_v42, 0.0  ;;  %v1410_v62 = vpop.permute.xlu1 %1409 }
 0x483   : > { %1163 = vadd.xlane.f32.xlu0 %v1162_v43 }
 0x499   : > { %2682 = vrot.lane.b32.xlu0 %v2912_v25, %s2784_s13 }
 0x49d   : > { %1327 = vrot.lane.b32.xlu0 %v2927_v33, %s2785_s14 }
 0x50c   : > { %v1161_v44 = vpop.xlane.xlu0 %1160 }
 0x50d   : > { %2743 = vrcp.f32 %v1161_v44 }
 0x510   : > { %v1164_v46 = vpop.xlane.xlu0 %1163 }
 0x511   : > { %2745 = vrcp.f32 %v1164_v46 }
 0x514   : > { %v2683_v47 = vpop.permute.xlu0 %2682 }
 0x515   : > { %v2685_v48 = vunpack.i.h.bf16 %v2683_v47  ;;  %v2684_v49 = vunpack.i.l.bf16 %v2683_v47 }
 0x517   : > { %v2744_v51 = vpop.eup %2743  ;;  %v2599_v52 = vpack.c.bf16 %v2685_v48, %v2684_v49 }
 0x518   : > { %v1167_v55 = vmul.f32 %v2744_v51, %v2740_v40  ;;  %v1328_v63 = vpop.permute.xlu0 %1327 }
 0x519   : > { %2600 = vmatpush3.bf16.msra.mxu0 %v2599_v52 }
 0x51a   : > { %2604 = vmatprep.subr.bf16.mxu0 %v2779_v12 }
 0x51b   : > { %v2746_v56 = vpop.eup %2745 }
 0x51c   : > { %v1168_v59 = vmul.f32 %v2746_v56, %v2742_v42  ;;  %2492 = vmatmul.mubr.msk.f32.vlgmr.msra.gmra.mrb[6].mxu0 %vm454_vm0, %v1167_v55 }
 0x51d   : > { %2505 = vmatprep.mubr.msk.f32.mxu0 %vm2780_vm1, %v2781_v13 }
 0x51e   : > { %2499 = vmatmul.mubr.msk.f32.vlgmr.msra.gmra.mrb[12].mxu1 %vm454_vm0, %v1168_v59 }
 0x51f   : > { %2611 = vmatpush3.bf16.xpose.msk.msra.mxu1 %vm2905_vm3, %v2609_v60  ;;  %2512 = vmatprep.mubr.msk.f32.mxu1 %vm2780_vm1, %v2781_v13 }
 0x520   : > { %2615 = vmatprep.subr.bf16.mxu1 %v2779_v12 }
 0x522   : > { %2607 = vmatpush3.bf16.xpose.msk.msra.mxu0 %vm2905_vm3, %v2605_v61 }
 0x523   : > { %2612 = vmatprep.subr.bf16.mxu0 %v2779_v12 }
 0x526   : > { %2513 = vmatmul.mubr.msk.f32.vlgmr.msra.gmra.mrb[14].mxu1 %vm644_vm2, %v1410_v62 }
 0x527   : > { %2526 = vmatprep.mubr.msk.f32.mxu1 %vm2780_vm1, %v2781_v13 }
 0x529   : > { %2506 = vmatmul.mubr.msk.f32.vlgmr.msra.gmra.mrb[8].mxu0 %vm644_vm2, %v1328_v63 }
 0x52a   : > { %2519 = vmatprep.mubr.msk.f32.mxu0 %vm2780_vm1, %v2781_v13 }
 0x5ef   : > { %v3008_v0 = vpop.f32.mrb[6].mxu0 }
 0x5f0   : > { %v2493_v1 = vpop.f32.mrb[7].mxu0 }
 0x5f1   : > { %v3010_v2 = vpop.f32.mrb[12].mxu1 }
 0x5f2   : > { %v2500_v3 = vpop.f32.mrb[13].mxu1 }
 0x5f9   : > { %v1487_v4 = vpop.f32.mrb[14].mxu1 }
 0x5fa   : > { %v2514_v5 = vpop.f32.mrb[15].mxu1  ;;  %v1494_v6 = vsel %vm454_vm0, %v1487_v4, -inf }
 0x5fb   : > { %1495 = vmax.xlane.f32.xlu1 %v1494_v6 }
 0x5fc   : > { %v1405_v7 = vpop.f32.mrb[8].mxu0 }
 0x5fd   : > { %v2507_v8 = vpop.f32.mrb[9].mxu0  ;;  %v1491_v9 = vsel %vm454_vm0, %v1405_v7, -inf }
 0x5fe   : > { %1492 = vmax.xlane.f32.xlu0 %v1491_v9 }
 0x60c   : > { %2707 = vrot.lane.b32.xlu1 %v2919_v30, %s2786_s16 }
 0x610   : > { %2712 = vrot.lane.b32.xlu1 %v2912_v25, %s2787_s17 }
 0x614   : > { %2717 = vrot.lane.b32.xlu1 %v2919_v30, %s2787_s17 }
 0x618   : > { %1753 = vrot.lane.b32.xlu1 %v2937_v34, %s2787_s17 }
 0x688   : > { %v1496_v10 = vpop.xlane.xlu1 %1495 }
 0x689   : > { %v1498_v14 = vsub.f32 %v1487_v4, %v1496_v10 }
 0x68b   : > { %v1493_v16 = vpop.xlane.xlu0 %1492  ;;  %v1501_v22 = vmul.f32 1.442695, %v1498_v14 }
 0x68c   : > { %v2708_v17 = vpop.permute.xlu1 %2707  ;;  %v1497_v18 = vsub.f32 %v1405_v7, %v1493_v16 }
 0x68d   : > { %v2710_v19 = vunpack.i.h.bf16 %v2708_v17  ;;  %v2709_v20 = vunpack.i.l.bf16 %v2708_v17 }
 0x68e   : > { %v1499_v23 = vmul.f32 1.442695, %v1497_v18 }
 0x68f   : > { %v2616_v24 = vpack.c.bf16 %v2710_v19, %v2709_v20 }
 0x690   : > { %2747 = vpow2.f32 %v1499_v23  ;;  %v2713_v35 = vpop.permute.xlu1 %2712 }
 0x691   : > { %2617 = vmatpush3.bf16.msra.mxu1 %v2616_v24  ;;  %2749 = vpow2.f32 %v1501_v22  ;;  %v2715_v47 = vunpack.i.h.bf16 %v2713_v35 }
 0x692   : > { %2622 = vmatprep.subr.bf16.mxu1 %v2779_v12 }
 0x694   : > { %v2718_v40 = vpop.permute.xlu1 %2717 }
 0x695   : > { %v2720_v43 = vunpack.i.h.bf16 %v2718_v40  ;;  %v2719_v44 = vunpack.i.l.bf16 %v2718_v40 }
 0x697   : > { %v2623_v49 = vpack.c.bf16 %v2720_v43, %v2719_v44 }
 0x698   : > { %v1754_v51 = vpop.permute.xlu1 %1753 }
 0x69a   : > { %v2748_v26 = vpop.eup %2747 }
 0x69b   : > { %v1503_v27 = vsel %vm454_vm0, %v2748_v26, 0.0  ;;  %v2750_v28 = vpop.eup %2749 }
 0x69c   : > { %1504 = vadd.xlane.f32.xlu0 %v1503_v27  ;;  %v1506_v34 = vsel %vm454_vm0, %v2750_v28, 0.0 }
 0x6a0   : > { %1507 = vadd.xlane.f32.xlu0 %v1506_v34 }
 0x6b6   : > { %2702 = vrot.lane.b32.xlu0 %v2912_v25, %s2786_s16 }
 0x6ba   : > { %1671 = vrot.lane.b32.xlu0 %v2927_v33, %s2787_s17  ;;  %v2714_v33 = vunpack.i.l.bf16 %v2713_v35 }
 0x6bc   : > { %v2619_v50 = vpack.c.bf16 %v2715_v47, %v2714_v33 }
 0x729   : > { %v1505_v31 = vpop.xlane.xlu0 %1504 }
 0x72a   : > { %2751 = vrcp.f32 %v1505_v31 }
 0x72d   : > { %v1508_v36 = vpop.xlane.xlu0 %1507 }
 0x72e   : > { %2753 = vrcp.f32 %v1508_v36 }
 0x731   : > { %v2703_v37 = vpop.permute.xlu0 %2702 }
 0x732   : > { %v2705_v38 = vunpack.i.h.bf16 %v2703_v37  ;;  %v2704_v39 = vunpack.i.l.bf16 %v2703_v37 }
 0x734   : > { %v2752_v41 = vpop.eup %2751  ;;  %v2613_v42 = vpack.c.bf16 %v2705_v38, %v2704_v39 }
 0x735   : > { %v1511_v45 = vmul.f32 %v2752_v41, %v2748_v26  ;;  %v1672_v52 = vpop.permute.xlu0 %1671 }
 0x736   : > { %2614 = vmatpush3.bf16.msra.mxu0 %v2613_v42 }
 0x737   : > { %2618 = vmatprep.subr.bf16.mxu0 %v2779_v12 }
 0x738   : > { %v2754_v46 = vpop.eup %2753 }
 0x739   : > { %v1512_v48 = vmul.f32 %v2754_v46, %v2750_v28  ;;  %2520 = vmatmul.mubr.msk.f32.vlgmr.msra.gmra.mrb[10].mxu0 %vm454_vm0, %v1511_v45 }
 0x73a   : > { %2533 = vmatprep.mubr.msk.f32.mxu0 %vm2780_vm1, %v2781_v13 }
 0x73b   : > { %2527 = vmatmul.mubr.msk.f32.vlgmr.msra.gmra.mrb[16].mxu1 %vm454_vm0, %v1512_v48 }
 0x73c   : > { %2625 = vmatpush3.bf16.xpose.msk.msra.mxu1 %vm2905_vm3, %v2623_v49  ;;  %2540 = vmatprep.mubr.msk.f32.mxu1 %vm2780_vm1, %v2781_v13 }
 0x73d   : > { %2629 = vmatprep.subr.bf16.mxu1 %v2779_v12 }
 0x73f   : > { %2621 = vmatpush3.bf16.xpose.msk.msra.mxu0 %vm2905_vm3, %v2619_v50 }
 0x740   : > { %2626 = vmatprep.subr.bf16.mxu0 %v2779_v12 }
 0x743   : > { %2541 = vmatmul.mubr.msk.f32.vlgmr.msra.gmra.mrb[18].mxu1 %vm644_vm2, %v1754_v51 }
 0x744   : > { %2554 = vmatprep.mubr.msk.f32.mxu1 %vm2780_vm1, %v2781_v13 }
 0x746   : > { %2534 = vmatmul.mubr.msk.f32.vlgmr.msra.gmra.mrb[12].mxu0 %vm644_vm2, %v1672_v52 }
 0x747   : > { %2547 = vmatprep.mubr.msk.f32.mxu0 %vm2780_vm1, %v2781_v13 }
 0x80c   : > { %v1588_v53 = vpop.f32.mrb[10].mxu0 }
 0x80d   : > { %v2521_v54 = vpop.f32.mrb[11].mxu0 }
 0x80e   : > { %v1667_v55 = vpop.f32.mrb[16].mxu1  ;;  %v2095_v54 = vld [vmem:[%s3113_s6 + $0x8] sm:$0xff] }
 0x80f   : > { %v2528_v56 = vpop.f32.mrb[17].mxu1 }
 0x810   : > { %v2096_v56 = vld [vmem:[%s3113_s6 + $0x10] sm:$0xff] }
 0x816   : > { %v1831_v21 = vpop.f32.mrb[18].mxu1 }
 0x817   : > { %v2542_v57 = vpop.f32.mrb[19].mxu1  ;;  %v1838_v12 = vsel %vm454_vm0, %v1831_v21, -inf }
 0x818   : > { %1839 = vmax.xlane.f32.xlu1 %v1838_v12 }
 0x819   : > { %v1749_v58 = vpop.f32.mrb[12].mxu0 }
 0x81a   : > { %v2535_v59 = vpop.f32.mrb[13].mxu0  ;;  %v1835_v60 = vsel %vm454_vm0, %v1749_v58, -inf }
 0x81b   : > { %1836 = vmax.xlane.f32.xlu0 %v1835_v60 }
 0x829   : > { %2727 = vrot.lane.b32.xlu1 %v2919_v30, %s2788_s18 }
 0x82d   : > { %2017 = vrot.lane.b32.xlu1 %v3008_v0, %s2789_s19 }
 0x831   : > { %2019 = vrot.lane.b32.xlu1 %v3010_v2, %s2789_s19 }
 0x835   : > { %2027 = vrot.lane.b32.xlu1 %v1667_v55, %s2790_s20 }
 0x8a5   : > { %v1840_v13 = vpop.xlane.xlu1 %1839 }
 0x8a6   : > { %v1842_v61 = vsub.f32 %v1831_v21, %v1840_v13  ;;  %v2097_v21 = vld [vmem:[%s3113_s6 + $0x18] sm:$0xff] }
 0x8a7   : > { %v2636_v57 = vpack.c.bf16 %v2097_v21, %v2096_v56 }
 0x8a8   : > { %v1837_v62 = vpop.xlane.xlu0 %1836  ;;  %v1845_v5 = vmul.f32 1.442695, %v1842_v61 }
 0x8a9   : > { %v2728_v63 = vpop.permute.xlu1 %2727  ;;  %v1841_v1 = vsub.f32 %v1749_v58, %v1837_v62 }
 0x8aa   : > { %v2730_v3 = vunpack.i.h.bf16 %v2728_v63  ;;  %v2729_v4 = vunpack.i.l.bf16 %v2728_v63  ;;  %v2355_v63 = vld [vmem:[%s3115_s8] ss:$0 sm:$0xff] }
 0x8ab   : > { %v1843_v6 = vmul.f32 1.442695, %v1841_v1 }
 0x8ac   : > { %v2630_v7 = vpack.c.bf16 %v2730_v3, %v2729_v4  ;;  %v2356_v3 = vld [vmem:[%s3116_s9] ss:$0 sm:$0xff] }
 0x8ad   : > { %2755 = vpow2.f32 %v1843_v6  ;;  %v2018_v28 = vpop.permute.xlu1 %2017 }
 0x8ae   : > { %2631 = vmatpush3.bf16.msra.mxu1 %v2630_v7  ;;  %2757 = vpow2.f32 %v1845_v5  ;;  %v2039_v36 = vsel %vm644_vm2, %v2974_v11, %v2018_v28 }
 0x8b1   : > { %v2020_v34 = vpop.permute.xlu1 %2019 }
 0x8b2   : > { %v2040_v39 = vsel %vm644_vm2, %v2976_v15, %v2020_v34 }
 0x8b5   : > { %v2028_v35 = vpop.permute.xlu1 %2027 }
 0x8b6   : > { %v2042_v41 = vsel %vm454_vm0, %v2040_v39, %v2028_v35 }
 0x8b7   : > { %v2756_v30 = vpop.eup %2755 }
 0x8b8   : > { %v1847_v0 = vsel %vm454_vm0, %v2756_v30, 0.0  ;;  %v2758_v8 = vpop.eup %2757 }
 0x8b9   : > { %1848 = vadd.xlane.f32.xlu0 %v1847_v0  ;;  %v1850_v2 = vsel %vm454_vm0, %v2758_v8, 0.0 }
 0x8bd   : > { %1851 = vadd.xlane.f32.xlu0 %v1850_v2 }
 0x8d3   : > { %2722 = vrot.lane.b32.xlu0 %v2912_v25, %s2788_s18 }
 0x8d7   : > { %2025 = vrot.lane.b32.xlu0 %v1588_v53, %s2790_s20 }
 0x946   : > { %v1849_v9 = vpop.xlane.xlu0 %1848 }
 0x947   : > { %2759 = vrcp.f32 %v1849_v9 }
 0x94a   : > { %v1852_v10 = vpop.xlane.xlu0 %1851 }
 0x94b   : > { %2761 = vrcp.f32 %v1852_v10 }
 0x94e   : > { %v2723_v14 = vpop.permute.xlu0 %2722 }
 0x94f   : > { %v2725_v16 = vunpack.i.h.bf16 %v2723_v14  ;;  %v2724_v17 = vunpack.i.l.bf16 %v2723_v14 }
 0x951   : > { %v2760_v18 = vpop.eup %2759  ;;  %v2627_v19 = vpack.c.bf16 %v2725_v16, %v2724_v17 }
 0x952   : > { %v1855_v20 = vmul.f32 %v2760_v18, %v2756_v30  ;;  %v2026_v31 = vpop.permute.xlu0 %2025 }
 0x953   : > { %2628 = vmatpush3.bf16.msra.mxu0 %v2627_v19  ;;  %v2041_v37 = vsel %vm454_vm0, %v2039_v36, %v2026_v31 }
 0x955   : > { %v2762_v22 = vpop.eup %2761 }
 0x956   : > { %v1856_v23 = vmul.f32 %v2762_v22, %v2758_v8  ;;  %2548 = vmatmul.mubr.msk.f32.vlgmr.msra.gmra.mrb[14].mxu0 %vm454_vm0, %v1855_v20  ;;  %v2357_v8 = vld [vmem:[%s3114_s7] ss:$0 sm:$0xff] }
 0x958   : > { %2555 = vmatmul.mubr.msk.f32.vlgmr.msra.gmra.mrb[20].mxu1 %vm454_vm0, %v1856_v23 }
 0xa29   : > { %v1932_v24 = vpop.f32.mrb[14].mxu0 }
 0xa2a   : > { %2033 = vrot.lane.b32.xlu0 %v1932_v24, %s2791_s22  ;;  %v2549_v25 = vpop.f32.mrb[15].mxu0 }
 0xa2b   : > { %v2011_v26 = vpop.f32.mrb[20].mxu1 }
 0xa2c   : > { %2035 = vrot.lane.b32.xlu1 %v2011_v26, %s2791_s22  ;;  %v2556_v27 = vpop.f32.mrb[21].mxu1 }
 0xa9c   : > { %v2034_v38 = vpop.permute.xlu0 %2033 }
 0xa9d   : > { %v2044_v40 = vsel %vm2043_vm4, %v2041_v37, %v2034_v38 }
 0xa9e   : > { %v2036_v42 = vpop.permute.xlu1 %2035  ;;  %v2046_v43 = vadd.f32 %v2044_v40, %v2916_v29 }
 0xa9f   : > { %v2045_v44 = vsel %vm2043_vm4, %v2042_v41, %v2036_v42 }
 0xaa0   : > { %v2051_v45 = vsel %vm2050_vm5, %v2046_v43, 0.0  ;;  %v2047_v46 = vadd.f32 %v2045_v44, %v2924_v32  ;;  %v2094_v32 = vld [vmem:[%s3113_s6] sm:$0xff] }
 0xaa1   : > { %2052 = vadd.xlane.f32.xlu0 %v2051_v45  ;;  %v2632_v55 = vpack.c.bf16 %v2095_v54, %v2094_v32  ;;  %v2360_v44 = vld [vmem:[%s3117_s10] ss:$0 sm:$0xff] }
 0xaa2   : > { %v2054_v11 = vsel %vm2050_vm5, %v2047_v46, 0.0 }
 0xaa3   : > { %2055 = vadd.xlane.f32.xlu1 %v2054_v11  ;;  %2633 = vmatprep.subr.bf16.mxu0 %v2632_v55 }
 0xaa4   : > { %2635 = vmatpush3.bf16.msra.mxu0 %v2632_v55 }
 0xaa5   : > { %2637 = vmatprep.subr.bf16.mxu0 %v2636_v57 }
 0xaa8   : > { %2639 = vmatpush3.bf16.msra.mxu0 %v2636_v57 }
 0xb2e   : > { %v2053_v47 = vpop.xlane.xlu0 %2052 }
 0xb2f   : > { %v2058_v33 = vmul.f32 0.03125, %v2053_v47  ;;  %v2361_v47 = vld [vmem:[%s3118_s11] ss:$0 sm:$0xff] }
 0xb30   : > { %v2056_v48 = vpop.xlane.xlu1 %2055 }
 0xb31   : > { %v2060_v15 = vsub.f32 %v2046_v43, %v2058_v33  ;;  %v2059_v49 = vmul.f32 0.03125, %v2056_v48 }
 0xb33   : > { %v2061_v50 = vsub.f32 %v2047_v46, %v2059_v49  ;;  %v2062_v51 = vmul.f32 %v2060_v15, %v2060_v15 }
 0xb35   : > { %v2064_v52 = vsel %vm2050_vm5, %v2062_v51, 0.0  ;;  %v2063_v53 = vmul.f32 %v2061_v50, %v2061_v50 }
 0xb36   : > { %2065 = vadd.xlane.f32.xlu0 %v2064_v52 }
 0xb37   : > { %v2067_v29 = vsel %vm2050_vm5, %v2063_v53, 0.0 }
 0xb3a   : > { %2068 = vadd.xlane.f32.xlu0 %v2067_v29 }
 0xbc3   : > { %v2066_v12 = vpop.xlane.xlu0 %2065 }
 0xbc4   : > { %v2070_v58 = vmul.f32 0.03125, %v2066_v12 }
 0xbc6   : > { %v2072_v59 = vadd.f32 1e-05, %v2070_v58 }
 0xbc7   : > { %v2069_v60 = vpop.xlane.xlu0 %2068 }
 0xbc8   : > { %2763 = vrsqrt.f32 %v2072_v59  ;;  %v2071_v13 = vmul.f32 0.03125, %v2069_v60 }
 0xbca   : > { %v2073_v61 = vadd.f32 1e-05, %v2071_v13 }
 0xbcc   : > { %2765 = vrsqrt.f32 %v2073_v61 }
 0xbd2   : > { %v2764_v62 = vpop.eup %2763 }
 0xbd3   : > { %v2076_v1 = vmul.f32 %v2764_v62, %v2060_v15 }
 0xbd5   : > { %v2084_v4 = vmul.f32 %v2355_v63, %v2076_v1 }
 0xbd6   : > { %v2766_v5 = vpop.eup %2765 }
 0xbd7   : > { %v2077_v6 = vmul.f32 %v2766_v5, %v2061_v50  ;;  %v2092_v7 = vadd.f32 %v2356_v3, %v2084_v4 }
 0xbd9   : > { %v2085_v30 = vmul.f32 %v2355_v63, %v2077_v6  ;;  %2565 = vmatprep.mubr.msk.f32.mxu0 %vm2050_vm5, %v2092_v7 }
 0xbdb   : > { %v2093_v0 = vadd.f32 %v2356_v3, %v2085_v30 }
 0xbdd   : > { %2566 = vmatmul.mubr.msk.f32.vlgmr.msra.gmra.mrb[16].mxu0 %vm2050_vm5, %v2093_v0 }
 0xcb0   : > { %v2567_v2 = vpop.f32.mrb[16].mxu0 }
 0xcb1   : > { %v2183_v9 = vadd.f32 %v2567_v2, %v2357_v8  ;;  %v2177_v10 = vpop.f32.mrb[17].mxu0 }
 0xcb2   : > { %v2178_v14 = vadd.f32 %v2357_v8, %v2177_v10 }
 0xcb3   : > { %v2187_v16 = vmax.f32 %v2183_v9, 0.0 }
 0xcb4   : > { %v2186_v17 = vmax.f32 %v2178_v14, 0.0 }
 0xcb5   : > { %v2189_v18 = vadd.f32 %v2187_v16, %v2093_v0 }
 0xcb6   : > { %v2188_v19 = vadd.f32 %v2186_v17, %v2092_v7 }
 0xcb7   : > { %v2195_v20 = vsel %vm2050_vm5, %v2189_v18, 0.0 }
 0xcb8   : > { %2196 = vadd.xlane.f32.xlu1 %v2195_v20  ;;  %v2192_v22 = vsel %vm2050_vm5, %v2188_v19, 0.0 }
 0xcb9   : > { %2193 = vadd.xlane.f32.xlu0 %v2192_v22 }
 0xd45   : > { %v2197_v23 = vpop.xlane.xlu1 %2196 }
 0xd46   : > { %v2199_v24 = vmul.f32 0.03125, %v2197_v23  ;;  %v2194_v25 = vpop.xlane.xlu0 %2193 }
 0xd47   : > { %v2198_v26 = vmul.f32 0.03125, %v2194_v25 }
 0xd48   : > { %v2201_v27 = vsub.f32 %v2189_v18, %v2199_v24 }
 0xd49   : > { %v2200_v28 = vsub.f32 %v2188_v19, %v2198_v26 }
 0xd4a   : > { %v2203_v34 = vmul.f32 %v2201_v27, %v2201_v27 }
 0xd4b   : > { %v2202_v31 = vmul.f32 %v2200_v28, %v2200_v28 }
 0xd4c   : > { %v2207_v35 = vsel %vm2050_vm5, %v2203_v34, 0.0 }
 0xd4d   : > { %2208 = vadd.xlane.f32.xlu1 %v2207_v35  ;;  %v2204_v36 = vsel %vm2050_vm5, %v2202_v31, 0.0 }
 0xd4e   : > { %2205 = vadd.xlane.f32.xlu0 %v2204_v36 }
 0xdda   : > { %v2209_v37 = vpop.xlane.xlu1 %2208 }
 0xddb   : > { %v2211_v38 = vmul.f32 0.03125, %v2209_v37  ;;  %v2206_v39 = vpop.xlane.xlu0 %2205 }
 0xddc   : > { %v2210_v40 = vmul.f32 0.03125, %v2206_v39 }
 0xddd   : > { %v2213_v41 = vadd.f32 1e-05, %v2211_v38 }
 0xdde   : > { %v2212_v42 = vadd.f32 1e-05, %v2210_v40 }
 0xddf   : > { %2767 = vrsqrt.f32 %v2213_v41 }
 0xde0   : > { %2769 = vrsqrt.f32 %v2212_v42 }
 0xde9   : > { %v2768_v43 = vpop.eup %2767 }
 0xdea   : > { %v2770_v45 = vpop.eup %2769  ;;  %v2217_v46 = vmul.f32 %v2768_v43, %v2201_v27 }
 0xdeb   : > { %v2216_v11 = vmul.f32 %v2770_v45, %v2200_v28 }
 0xdec   : > { %v2225_v33 = vmul.f32 %v2360_v44, %v2217_v46 }
 0xded   : > { %v2224_v48 = vmul.f32 %v2360_v44, %v2216_v11 }
 0xdee   : > { %v2233_v49 = vadd.f32 %v2361_v47, %v2225_v33 }
 0xdef   : > { %v2232_v15 = vadd.f32 %v2361_v47, %v2224_v48 }
 0xdf0   : > { %2235 = vst.msk [vmem:[%s437_s29 + $0x8] sm:$0xff] %vm2050_vm5, %v2233_v49 }
 0xdf1   : > { %2234 = vst.msk [vmem:[%s437_s29] sm:$0xff] %vm2050_vm5, %v2232_v15 }
 0xdf2 PF: > { %s22_s21 = sadd.s32 1, %s2777_s21  }
 0xdf3   : > { %p19_p5 = scmp.ge.s32.totalorder %s22_s21, 6  }
 0xdf5   :  { %21 = sbr.rel (!%p19_p5) target bundleno = 1 (0x1), region = 101 }

</bundles_post_ra>
